<compile_context>
chip_gen: v7x
topology: tpu7x:2x2x1
jax: 0.10.0
libtpu: 0.0.40
codegen_flags: <defaults>
</compile_context>

<pallas_src>
import math
import functools

import jax
import jax.numpy as jnp
from jax.experimental import pallas as pl
from jax.experimental.pallas import tpu as pltpu


def _mha_kernel(T, n_heads, scale,
                start_ref, end_ref,              # (Bt,1,1) int32
                q_ref, k_ref, v_ref,             # (Bt,Dk) bf16, (Bt*T,Dk) bf16, (Bt*T,Dv) bf16
                gh_ref, eh_ref,                  # (Dk,H) f32, (H,Dv) f32  (head group/expand)
                selt_ref, selb_ref,              # (Bt*T,Bt) f32, (Bt,Bt*T) f32 (batch selectors)
                wq_ref, bq_ref, wk_ref, bk_ref,
                wv_ref, bv_ref, wo_ref, bo_ref,  # bf16 weights (in,out), f32 biases (1,out)
                out_ref, att_ref):               # (Bt,Dv) f32, (Bt,T) f32
    f32 = jnp.float32
    Bt, Dk = q_ref.shape

    # --- q/k/v projections: bf16 operands, f32 accumulation (MXU) ---
    qp = jnp.dot(q_ref[...], wq_ref[...], preferred_element_type=f32) + bq_ref[...]   # (Bt,Dk)
    kp = jnp.dot(k_ref[...], wk_ref[...], preferred_element_type=f32) + bk_ref[...]   # (Bt*T,Dk)
    vp = jnp.dot(v_ref[...], wv_ref[...], preferred_element_type=f32) + bv_ref[...]   # (Bt*T,Dv)

    # replicate each q row T times with a constant 0/1 selector matmul (MXU, no relayout)
    qp_rep = jnp.dot(selt_ref[...], qp, preferred_element_type=f32)                    # (Bt*T,Dk)

    # per-head scores: scores[b,t,h] = sum_{d in head h} qp[b,d] * kp[b,t,d]
    scores = jnp.dot(qp_rep * kp, gh_ref[...], preferred_element_type=f32)             # (Bt*T,H)
    scores = scores.reshape(Bt, T, n_heads) * scale

    # mask timesteps outside [start, end] (inclusive), vectorized over the batch block
    t_ids = jax.lax.broadcasted_iota(jnp.int32, (Bt, T, 1), 1)
    mask = (t_ids < start_ref[...]) | (t_ids > end_ref[...])                            # (Bt,T,1)
    scores = jnp.where(mask, -jnp.inf, scores)
    all_masked = jnp.min(mask.astype(f32), axis=1, keepdims=True) > 0.5                 # (Bt,1,1)
    scores = jnp.where(all_masked, 1.0, scores)                                         # torch fallback

    # softmax over time (f32); reciprocal on the otherwise-idle EUP
    m = jnp.max(scores, axis=1, keepdims=True)
    p = jnp.exp(scores - m)
    att = p * pl.reciprocal(jnp.sum(p, axis=1, keepdims=True), approx=True)             # (Bt,T,H)

    # expand heads back to channels, weight values, reduce over time on the MXU
    att_full = jnp.dot(att.reshape(Bt * T, n_heads), eh_ref[...],
                       preferred_element_type=f32)                                      # (Bt*T,Dv)
    concat = jnp.dot(selb_ref[...], att_full * vp, preferred_element_type=f32)          # (Bt,Dv)

    out_ref[...] = jnp.dot(concat.astype(jnp.bfloat16), wo_ref[...],
                           preferred_element_type=f32) + bo_ref[...]                    # (Bt,Dv)
    att_ref[...] = jnp.sum(att, axis=2) * (1.0 / n_heads)                               # (Bt,T)


def multihead_attention(q, k, v, start_ind, end_ind, params, n_heads, temperature):
    B, T, Dk = k.shape
    Dv = v.shape[-1]
    dk_i = Dk // n_heads
    dv_i = Dv // n_heads

    # batch blocking: Bt rows per grid step (multiple of 8, capped at 128 to fit MXU M-dim
    # and keep double-buffered blocks tiny even on v7x's 64 MiB VMEM)
    Bt = min(128, ((B + 7) // 8) * 8)
    Bp = ((B + Bt - 1) // Bt) * Bt
    pad = Bp - B

    wq, bq, wk, bk, wv, bv, wo, bo = params

    # pad the batch; padded rows are fully un-masked (start=0, end=T-1) so softmax stays
    # finite, and are sliced off on return.
    q2 = jnp.pad(q, ((0, pad), (0, 0))).astype(jnp.bfloat16)                         # (Bp,Dk)
    k2 = jnp.pad(k, ((0, pad), (0, 0), (0, 0))).reshape(Bp * T, Dk).astype(jnp.bfloat16)
    v2 = jnp.pad(v, ((0, pad), (0, 0), (0, 0))).reshape(Bp * T, Dv).astype(jnp.bfloat16)
    s_i = jnp.pad(start_ind.astype(jnp.int32), (0, pad)).reshape(Bp, 1, 1)
    e_i = jnp.pad(end_ind.astype(jnp.int32), (0, pad),
                  constant_values=T - 1).reshape(Bp, 1, 1)

    # constants hoisted out of the kernel (constant index_map -> stay VMEM-resident)
    g_mat = (jnp.arange(Dk)[:, None] // dk_i ==
             jnp.arange(n_heads)[None, :]).astype(jnp.float32)                       # (Dk,H)
    e_mat = (jnp.arange(Dv)[None, :] // dv_i ==
             jnp.arange(n_heads)[:, None]).astype(jnp.float32)                       # (H,Dv)
    sel_t = (jnp.arange(Bt * T)[:, None] // T ==
             jnp.arange(Bt)[None, :]).astype(jnp.float32)                            # (Bt*T,Bt)
    sel_b = sel_t.T                                                                   # (Bt,Bt*T)

    # torch-style (out,in) weights -> (in,out) bf16; biases -> (1,out) f32
    wqt = wq.T.astype(jnp.bfloat16); wkt = wk.T.astype(jnp.bfloat16)
    wvt = wv.T.astype(jnp.bfloat16); wot = wo.T.astype(jnp.bfloat16)
    bq2 = bq.reshape(1, Dk).astype(jnp.float32)
    bk2 = bk.reshape(1, Dk).astype(jnp.float32)
    bv2 = bv.reshape(1, Dv).astype(jnp.float32)
    bo2 = bo.reshape(1, Dv).astype(jnp.float32)

    kernel = functools.partial(_mha_kernel, T, n_heads,
                               float(temperature) / math.sqrt(dk_i))

    const = lambda i: (0, 0)   # weight/constant blocks never change; no re-DMA across steps
    # (for very large Bt*T tiles these could also get pipeline_mode=pl.Buffered(1))
    grid_spec = pltpu.PrefetchScalarGridSpec(
        num_scalar_prefetch=0,
        grid=(Bp // Bt,),
        in_specs=[
            pl.BlockSpec((Bt, 1, 1), lambda i: (i, 0, 0)),      # start
            pl.BlockSpec((Bt, 1, 1), lambda i: (i, 0, 0)),      # end
            pl.BlockSpec((Bt, Dk), lambda i: (i, 0)),           # q
            pl.BlockSpec((Bt * T, Dk), lambda i: (i, 0)),       # k (time-flattened)
            pl.BlockSpec((Bt * T, Dv), lambda i: (i, 0)),       # v (time-flattened)
            pl.BlockSpec((Dk, n_heads), const),                 # head grouping
            pl.BlockSpec((n_heads, Dv), const),                 # head expansion
            pl.BlockSpec((Bt * T, Bt), const),                  # q replicator
            pl.BlockSpec((Bt, Bt * T), const),                  # time reducer
            pl.BlockSpec((Dk, Dk), const), pl.BlockSpec((1, Dk), const),   # Wq, bq
            pl.BlockSpec((Dk, Dk), const), pl.BlockSpec((1, Dk), const),   # Wk, bk
            pl.BlockSpec((Dv, Dv), const), pl.BlockSpec((1, Dv), const),   # Wv, bv
            pl.BlockSpec((Dv, Dv), const), pl.BlockSpec((1, Dv), const),   # Wo, bo
        ],
        out_specs=(
            pl.BlockSpec((Bt, Dv), lambda i: (i, 0)),           # out (lane-dense)
            pl.BlockSpec((Bt, T), lambda i: (i, 0)),            # att (lane-dense)
        ),
    )

    out, att = pl.pallas_call(
        kernel,
        out_shape=(jax.ShapeDtypeStruct((Bp, Dv), jnp.float32),
                   jax.ShapeDtypeStruct((Bp, T), jnp.float32)),
        grid_spec=grid_spec,
        compiler_params=pltpu.CompilerParams(
            dimension_semantics=("parallel",)),
    )(s_i, e_i, q2, k2, v2, g_mat, e_mat, sel_t, sel_b,
      wqt, bq2, wkt, bk2, wvt, bv2, wot, bo2)

    return out[:B], att[:B]


def reference(q, k, v, start_ind, end_ind, params, n_heads, temperature):
    """Pure-JAX (f32) replica of the PyTorch forward for sanity checking."""
    wq, bq, wk, bk, wv, bv, wo, bo = params
    B, T, Dk = k.shape
    Dv = v.shape[-1]
    dk_i, dv_i = Dk // n_heads, Dv // n_heads
    qp = q @ wq.T + bq
    kp = k @ wk.T + bk
    vp = v @ wv.T + bv
    qh = qp.reshape(B, n_heads, dk_i)
    kh = kp.reshape(B, T, n_heads, dk_i)
    vh = vp.reshape(B, T, n_heads, dv_i)
    scores = (qh[:, None] * kh).sum(-1) / math.sqrt(dk_i) * temperature   # (B,T,H)
    t_ids = jnp.arange(T)[None, :]
    mask = (t_ids < start_ind[:, None]) | (t_ids > end_ind[:, None])      # (B,T)
    scores = jnp.where(mask[..., None], -jnp.inf, scores)
    allm = jnp.all(mask, axis=1)                                          # (B,)
    scores = jnp.where(allm[:, None, None], 1.0, scores)
    att = jax.nn.softmax(scores, axis=1)
    vals = (att[..., None] * vh).sum(axis=1)                              # (B,H,dv_i)
    concat = vals.reshape(B, Dv)
    out = concat @ wo.T + bo
    return out, att.mean(-1)


if __name__ == "__main__":
    # hp: nz_enc=32, nz_attn_key=32, n_attention_heads=4, attention_temperature=1.0
    B, T, H = 2, 8, 4
    NZ, NZ_KEY = 32, 32
    TEMP = 1.0

    key = jax.random.PRNGKey(0)
    ks = jax.random.split(key, 12)
    q = jax.random.normal(ks[0], (B, NZ_KEY), jnp.float32)
    k = jax.random.normal(ks[1], (B, T, NZ_KEY), jnp.float32)
    v = jax.random.normal(ks[2], (B, T, NZ), jnp.float32)
    start_ind = jnp.array([1, 0], dtype=jnp.int32)
    end_ind = jnp.array([5, 7], dtype=jnp.int32)

    def linear_params(kw, kb, out_dim, in_dim):
        bound = 1.0 / math.sqrt(in_dim)
        w = jax.random.uniform(kw, (out_dim, in_dim), jnp.float32, -bound, bound)
        b = jax.random.uniform(kb, (out_dim,), jnp.float32, -bound, bound)
        return w, b

    wq, bq = linear_params(ks[3], ks[4], NZ_KEY, NZ_KEY)
    wk, bk = linear_params(ks[5], ks[6], NZ_KEY, NZ_KEY)
    wv, bv = linear_params(ks[7], ks[8], NZ, NZ)
    wo, bo = linear_params(ks[9], ks[10], NZ, NZ)
    params = (wq, bq, wk, bk, wv, bv, wo, bo)

    out, att = multihead_attention(q, k, v, start_ind, end_ind, params, H, TEMP)
    jax.block_until_ready((out, att))

    ref_out, ref_att = reference(q, k, v, start_ind, end_ind, params, H, TEMP)
    assert out.shape == (B, NZ) and att.shape == (B, T)
    assert jnp.allclose(out, ref_out, atol=1e-2, rtol=1e-2)
    assert jnp.allclose(att, ref_att, atol=1e-2, rtol=1e-2)
    print("KERNEL_OK")
</pallas_src>

<mosaic_0001>
module attributes {stable_mosaic.version = 11 : i64} {
  func.func @_mha_kernel(%arg0: i32, %arg1: memref<8x1x1xi32, #tpu.memory_space<vmem>>, %arg2: memref<8x1x1xi32, #tpu.memory_space<vmem>>, %arg3: memref<8x32xbf16, #tpu.memory_space<vmem>>, %arg4: memref<64x32xbf16, #tpu.memory_space<vmem>>, %arg5: memref<64x32xbf16, #tpu.memory_space<vmem>>, %arg6: memref<32x4xf32, #tpu.memory_space<vmem>>, %arg7: memref<4x32xf32, #tpu.memory_space<vmem>>, %arg8: memref<64x8xf32, #tpu.memory_space<vmem>>, %arg9: memref<8x64xf32, #tpu.memory_space<vmem>>, %arg10: memref<32x32xbf16, #tpu.memory_space<vmem>>, %arg11: memref<1x32xf32, #tpu.memory_space<vmem>>, %arg12: memref<32x32xbf16, #tpu.memory_space<vmem>>, %arg13: memref<1x32xf32, #tpu.memory_space<vmem>>, %arg14: memref<32x32xbf16, #tpu.memory_space<vmem>>, %arg15: memref<1x32xf32, #tpu.memory_space<vmem>>, %arg16: memref<32x32xbf16, #tpu.memory_space<vmem>>, %arg17: memref<1x32xf32, #tpu.memory_space<vmem>>, %arg18: memref<8x32xf32, #tpu.memory_space<vmem>>, %arg19: memref<8x8xf32, #tpu.memory_space<vmem>>) attributes {dimension_semantics = [#tpu.dimension_semantics<parallel>], iteration_bounds = array<i64: 1>, scalar_prefetch = 0 : i64, scratch_operands = 0 : i64, tpu.core_type = #tpu.core_type<tc>, window_params = [{transform_indices = @transform_0, window_bounds = array<i64: 8, 1, 1>}, {transform_indices = @transform_1, window_bounds = array<i64: 8, 1, 1>}, {transform_indices = @transform_2, window_bounds = array<i64: 8, 32>}, {transform_indices = @transform_3, window_bounds = array<i64: 64, 32>}, {transform_indices = @transform_4, window_bounds = array<i64: 64, 32>}, {pipeline_mode = #tpu.pipeline_mode<synchronous>, transform_indices = @transform_5, window_bounds = array<i64: 32, 4>}, {pipeline_mode = #tpu.pipeline_mode<synchronous>, transform_indices = @transform_6, window_bounds = array<i64: 4, 32>}, {pipeline_mode = #tpu.pipeline_mode<synchronous>, transform_indices = @transform_7, window_bounds = array<i64: 64, 8>}, {pipeline_mode = #tpu.pipeline_mode<synchronous>, transform_indices = @transform_8, window_bounds = array<i64: 8, 64>}, {pipeline_mode = #tpu.pipeline_mode<synchronous>, transform_indices = @transform_9, window_bounds = array<i64: 32, 32>}, {pipeline_mode = #tpu.pipeline_mode<synchronous>, transform_indices = @transform_10, window_bounds = array<i64: 1, 32>}, {pipeline_mode = #tpu.pipeline_mode<synchronous>, transform_indices = @transform_11, window_bounds = array<i64: 32, 32>}, {pipeline_mode = #tpu.pipeline_mode<synchronous>, transform_indices = @transform_12, window_bounds = array<i64: 1, 32>}, {pipeline_mode = #tpu.pipeline_mode<synchronous>, transform_indices = @transform_13, window_bounds = array<i64: 32, 32>}, {pipeline_mode = #tpu.pipeline_mode<synchronous>, transform_indices = @transform_14, window_bounds = array<i64: 1, 32>}, {pipeline_mode = #tpu.pipeline_mode<synchronous>, transform_indices = @transform_15, window_bounds = array<i64: 32, 32>}, {pipeline_mode = #tpu.pipeline_mode<synchronous>, transform_indices = @transform_16, window_bounds = array<i64: 1, 32>}, {transform_indices = @transform_17, window_bounds = array<i64: 8, 32>}, {transform_indices = @transform_18, window_bounds = array<i64: 8, 8>}]} {
    %c0 = arith.constant 0 : index
    %c0_0 = arith.constant 0 : index
    %0 = vector.load %arg3[%c0, %c0_0] : memref<8x32xbf16, #tpu.memory_space<vmem>>, vector<8x32xbf16>
    %c0_1 = arith.constant 0 : index
    %c0_2 = arith.constant 0 : index
    %1 = vector.load %arg10[%c0_1, %c0_2] : memref<32x32xbf16, #tpu.memory_space<vmem>>, vector<32x32xbf16>
    %cst = arith.constant dense<0.000000e+00> : vector<8x32xf32>
    %2 = tpu.matmul %0, %1, %cst {dimension_numbers = #tpu.dot_dimension_numbers<[1], [0], [0], [1], [0, 0, 1, 1], [], []>} : vector<8x32xbf16>, vector<32x32xbf16>, vector<8x32xf32> -> vector<8x32xf32>
    %c0_3 = arith.constant 0 : index
    %c0_4 = arith.constant 0 : index
    %3 = vector.load %arg11[%c0_3, %c0_4] : memref<1x32xf32, #tpu.memory_space<vmem>>, vector<1x32xf32>
    %4 = vector.broadcast %3 : vector<1x32xf32> to vector<8x32xf32>
    %5 = arith.addf %2, %4 : vector<8x32xf32>
    %c0_5 = arith.constant 0 : index
    %c0_6 = arith.constant 0 : index
    %6 = vector.load %arg4[%c0_5, %c0_6] : memref<64x32xbf16, #tpu.memory_space<vmem>>, vector<64x32xbf16>
    %c0_7 = arith.constant 0 : index
    %c0_8 = arith.constant 0 : index
    %7 = vector.load %arg12[%c0_7, %c0_8] : memref<32x32xbf16, #tpu.memory_space<vmem>>, vector<32x32xbf16>
    %cst_9 = arith.constant dense<0.000000e+00> : vector<64x32xf32>
    %8 = tpu.matmul %6, %7, %cst_9 {dimension_numbers = #tpu.dot_dimension_numbers<[1], [0], [0], [1], [0, 0, 1, 1], [], []>} : vector<64x32xbf16>, vector<32x32xbf16>, vector<64x32xf32> -> vector<64x32xf32>
    %c0_10 = arith.constant 0 : index
    %c0_11 = arith.constant 0 : index
    %9 = vector.load %arg13[%c0_10, %c0_11] : memref<1x32xf32, #tpu.memory_space<vmem>>, vector<1x32xf32>
    %10 = vector.broadcast %9 : vector<1x32xf32> to vector<64x32xf32>
    %11 = arith.addf %8, %10 : vector<64x32xf32>
    %c0_12 = arith.constant 0 : index
    %c0_13 = arith.constant 0 : index
    %12 = vector.load %arg5[%c0_12, %c0_13] : memref<64x32xbf16, #tpu.memory_space<vmem>>, vector<64x32xbf16>
    %c0_14 = arith.constant 0 : index
    %c0_15 = arith.constant 0 : index
    %13 = vector.load %arg14[%c0_14, %c0_15] : memref<32x32xbf16, #tpu.memory_space<vmem>>, vector<32x32xbf16>
    %cst_16 = arith.constant dense<0.000000e+00> : vector<64x32xf32>
    %14 = tpu.matmul %12, %13, %cst_16 {dimension_numbers = #tpu.dot_dimension_numbers<[1], [0], [0], [1], [0, 0, 1, 1], [], []>} : vector<64x32xbf16>, vector<32x32xbf16>, vector<64x32xf32> -> vector<64x32xf32>
    %c0_17 = arith.constant 0 : index
    %c0_18 = arith.constant 0 : index
    %15 = vector.load %arg15[%c0_17, %c0_18] : memref<1x32xf32, #tpu.memory_space<vmem>>, vector<1x32xf32>
    %16 = vector.broadcast %15 : vector<1x32xf32> to vector<64x32xf32>
    %17 = arith.addf %14, %16 : vector<64x32xf32>
    %c0_19 = arith.constant 0 : index
    %c0_20 = arith.constant 0 : index
    %18 = vector.load %arg8[%c0_19, %c0_20] : memref<64x8xf32, #tpu.memory_space<vmem>>, vector<64x8xf32>
    %cst_21 = arith.constant dense<0.000000e+00> : vector<64x32xf32>
    %19 = tpu.matmul %18, %5, %cst_21 {dimension_numbers = #tpu.dot_dimension_numbers<[1], [0], [0], [1], [0, 0, 1, 1], [], []>} : vector<64x8xf32>, vector<8x32xf32>, vector<64x32xf32> -> vector<64x32xf32>
    %20 = arith.mulf %19, %11 : vector<64x32xf32>
    %c0_22 = arith.constant 0 : index
    %c0_23 = arith.constant 0 : index
    %21 = vector.load %arg6[%c0_22, %c0_23] : memref<32x4xf32, #tpu.memory_space<vmem>>, vector<32x4xf32>
    %cst_24 = arith.constant dense<0.000000e+00> : vector<64x4xf32>
    %22 = tpu.matmul %20, %21, %cst_24 {dimension_numbers = #tpu.dot_dimension_numbers<[1], [0], [0], [1], [0, 0, 1, 1], [], []>} : vector<64x32xf32>, vector<32x4xf32>, vector<64x4xf32> -> vector<64x4xf32>
    %23 = vector.shape_cast %22 : vector<64x4xf32> to vector<8x8x4xf32>
    %cst_25 = arith.constant 0.353553385 : f32
    %24 = vector.broadcast %cst_25 : f32 to vector<8x8x4xf32>
    %25 = arith.mulf %23, %24 : vector<8x8x4xf32>
    %26 = tpu.iota {dimensions = array<i32: 1>} : vector<8x8x1xi32>
    %c0_26 = arith.constant 0 : index
    %c0_27 = arith.constant 0 : index
    %c0_28 = arith.constant 0 : index
    %27 = vector.load %arg1[%c0_26, %c0_27, %c0_28] : memref<8x1x1xi32, #tpu.memory_space<vmem>>, vector<8x1x1xi32>
    %28 = vector.broadcast %27 : vector<8x1x1xi32> to vector<8x8x1xi32>
    %29 = arith.cmpi slt, %26, %28 : vector<8x8x1xi32>
    %c0_29 = arith.constant 0 : index
    %c0_30 = arith.constant 0 : index
    %c0_31 = arith.constant 0 : index
    %30 = vector.load %arg2[%c0_29, %c0_30, %c0_31] : memref<8x1x1xi32, #tpu.memory_space<vmem>>, vector<8x1x1xi32>
    %31 = vector.broadcast %30 : vector<8x1x1xi32> to vector<8x8x1xi32>
    %32 = arith.cmpi sgt, %26, %31 : vector<8x8x1xi32>
    %33 = arith.ori %29, %32 : vector<8x8x1xi1>
    %cst_32 = arith.constant 0xFF800000 : f32
    %34 = vector.shape_cast %33 : vector<8x8x1xi1> to vector<8x8x1xi1>
    %35 = vector.broadcast %34 : vector<8x8x1xi1> to vector<8x8x4xi1>
    %36 = vector.broadcast %cst_32 : f32 to vector<8x8x4xf32>
    %37 = arith.select %35, %36, %25 : vector<8x8x4xi1>, vector<8x8x4xf32>
    %38 = arith.extui %33 : vector<8x8x1xi1> to vector<8x8x1xi32>
    %39 = arith.sitofp %38 : vector<8x8x1xi32> to vector<8x8x1xf32>
    %cst_33 = arith.constant dense<0x7F800000> : vector<8x1xf32>
    %40 = vector.multi_reduction <minimumf>, %39, %cst_33 [1] : vector<8x8x1xf32> to vector<8x1xf32>
    %41 = vector.shape_cast %40 : vector<8x1xf32> to vector<8x1x1xf32>
    %cst_34 = arith.constant 5.000000e-01 : f32
    %42 = vector.broadcast %cst_34 : f32 to vector<8x1x1xf32>
    %43 = arith.cmpf ogt, %41, %42 : vector<8x1x1xf32>
    %cst_35 = arith.constant 1.000000e+00 : f32
    %44 = vector.shape_cast %43 : vector<8x1x1xi1> to vector<8x1x1xi1>
    %45 = vector.broadcast %44 : vector<8x1x1xi1> to vector<8x8x4xi1>
    %46 = vector.broadcast %cst_35 : f32 to vector<8x8x4xf32>
    %47 = arith.select %45, %46, %37 : vector<8x8x4xi1>, vector<8x8x4xf32>
    %cst_36 = arith.constant dense<0xFF800000> : vector<8x4xf32>
    %48 = vector.multi_reduction <maximumf>, %47, %cst_36 [1] : vector<8x8x4xf32> to vector<8x4xf32>
    %49 = vector.shape_cast %48 : vector<8x4xf32> to vector<8x1x4xf32>
    %50 = vector.broadcast %49 : vector<8x1x4xf32> to vector<8x8x4xf32>
    %51 = arith.subf %47, %50 : vector<8x8x4xf32>
    %52 = math.exp %51 : vector<8x8x4xf32>
    %cst_37 = arith.constant dense<0.000000e+00> : vector<8x4xf32>
    %53 = vector.multi_reduction <add>, %52, %cst_37 [1] : vector<8x8x4xf32> to vector<8x4xf32>
    %54 = vector.shape_cast %53 : vector<8x4xf32> to vector<8x1x4xf32>
    %55 = tpu.reciprocal %54 {approx = true} : vector<8x1x4xf32> -> vector<8x1x4xf32>
    %56 = vector.broadcast %55 : vector<8x1x4xf32> to vector<8x8x4xf32>
    %57 = arith.mulf %52, %56 : vector<8x8x4xf32>
    %58 = vector.shape_cast %57 : vector<8x8x4xf32> to vector<64x4xf32>
    %c0_38 = arith.constant 0 : index
    %c0_39 = arith.constant 0 : index
    %59 = vector.load %arg7[%c0_38, %c0_39] : memref<4x32xf32, #tpu.memory_space<vmem>>, vector<4x32xf32>
    %cst_40 = arith.constant dense<0.000000e+00> : vector<64x32xf32>
    %60 = tpu.matmul %58, %59, %cst_40 {dimension_numbers = #tpu.dot_dimension_numbers<[1], [0], [0], [1], [0, 0, 1, 1], [], []>} : vector<64x4xf32>, vector<4x32xf32>, vector<64x32xf32> -> vector<64x32xf32>
    %c0_41 = arith.constant 0 : index
    %c0_42 = arith.constant 0 : index
    %61 = vector.load %arg9[%c0_41, %c0_42] : memref<8x64xf32, #tpu.memory_space<vmem>>, vector<8x64xf32>
    %62 = arith.mulf %60, %17 : vector<64x32xf32>
    %cst_43 = arith.constant dense<0.000000e+00> : vector<8x32xf32>
    %63 = tpu.matmul %61, %62, %cst_43 {dimension_numbers = #tpu.dot_dimension_numbers<[1], [0], [0], [1], [0, 0, 1, 1], [], []>} : vector<8x64xf32>, vector<64x32xf32>, vector<8x32xf32> -> vector<8x32xf32>
    %64 = arith.truncf %63 : vector<8x32xf32> to vector<8x32xbf16>
    %c0_44 = arith.constant 0 : index
    %c0_45 = arith.constant 0 : index
    %65 = vector.load %arg16[%c0_44, %c0_45] : memref<32x32xbf16, #tpu.memory_space<vmem>>, vector<32x32xbf16>
    %cst_46 = arith.constant dense<0.000000e+00> : vector<8x32xf32>
    %66 = tpu.matmul %64, %65, %cst_46 {dimension_numbers = #tpu.dot_dimension_numbers<[1], [0], [0], [1], [0, 0, 1, 1], [], []>} : vector<8x32xbf16>, vector<32x32xbf16>, vector<8x32xf32> -> vector<8x32xf32>
    %c0_47 = arith.constant 0 : index
    %c0_48 = arith.constant 0 : index
    %67 = vector.load %arg17[%c0_47, %c0_48] : memref<1x32xf32, #tpu.memory_space<vmem>>, vector<1x32xf32>
    %68 = vector.broadcast %67 : vector<1x32xf32> to vector<8x32xf32>
    %69 = arith.addf %66, %68 : vector<8x32xf32>
    %c0_49 = arith.constant 0 : index
    %c0_50 = arith.constant 0 : index
    %70 = vector.load %arg18[%c0_49, %c0_50] : memref<8x32xf32, #tpu.memory_space<vmem>>, vector<8x32xf32>
    tpu.vector_store %arg18[%c0_49, %c0_50], %69 {strides = array<i32>} : memref<8x32xf32, #tpu.memory_space<vmem>>, vector<8x32xf32>,
    %cst_51 = arith.constant dense<0.000000e+00> : vector<8x8xf32>
    %71 = vector.multi_reduction <add>, %57, %cst_51 [2] : vector<8x8x4xf32> to vector<8x8xf32>
    %cst_52 = arith.constant 2.500000e-01 : f32
    %72 = vector.broadcast %cst_52 : f32 to vector<8x8xf32>
    %73 = arith.mulf %71, %72 : vector<8x8xf32>
    %c0_53 = arith.constant 0 : index
    %c0_54 = arith.constant 0 : index
    %74 = vector.load %arg19[%c0_53, %c0_54] : memref<8x8xf32, #tpu.memory_space<vmem>>, vector<8x8xf32>
    tpu.vector_store %arg19[%c0_53, %c0_54], %73 {strides = array<i32>} : memref<8x8xf32, #tpu.memory_space<vmem>>, vector<8x8xf32>,
    return
  }
  func.func @transform_0(%arg0: i32) -> (i32, i32, i32) {
    %c0_i32 = arith.constant 0 : i32
    %c0_i32_0 = arith.constant 0 : i32
    %c0_i32_1 = arith.constant 0 : i32
    return %arg0, %c0_i32, %c0_i32_0 : i32, i32, i32
  }
  func.func @transform_1(%arg0: i32) -> (i32, i32, i32) {
    %c0_i32 = arith.constant 0 : i32
    %c0_i32_0 = arith.constant 0 : i32
    %c0_i32_1 = arith.constant 0 : i32
    return %arg0, %c0_i32, %c0_i32_0 : i32, i32, i32
  }
  func.func @transform_2(%arg0: i32) -> (i32, i32) {
    %c0_i32 = arith.constant 0 : i32
    %c0_i32_0 = arith.constant 0 : i32
    return %arg0, %c0_i32 : i32, i32
  }
  func.func @transform_3(%arg0: i32) -> (i32, i32) {
    %c0_i32 = arith.constant 0 : i32
    %c0_i32_0 = arith.constant 0 : i32
    return %arg0, %c0_i32 : i32, i32
  }
  func.func @transform_4(%arg0: i32) -> (i32, i32) {
    %c0_i32 = arith.constant 0 : i32
    %c0_i32_0 = arith.constant 0 : i32
    return %arg0, %c0_i32 : i32, i32
  }
  func.func @transform_5(%arg0: i32) -> (i32, i32) {
    %c0_i32 = arith.constant 0 : i32
    %c0_i32_0 = arith.constant 0 : i32
    %c0_i32_1 = arith.constant 0 : i32
    return %c0_i32, %c0_i32_0 : i32, i32
  }
  func.func @transform_6(%arg0: i32) -> (i32, i32) {
    %c0_i32 = arith.constant 0 : i32
    %c0_i32_0 = arith.constant 0 : i32
    %c0_i32_1 = arith.constant 0 : i32
    return %c0_i32, %c0_i32_0 : i32, i32
  }
  func.func @transform_7(%arg0: i32) -> (i32, i32) {
    %c0_i32 = arith.constant 0 : i32
    %c0_i32_0 = arith.constant 0 : i32
    %c0_i32_1 = arith.constant 0 : i32
    return %c0_i32, %c0_i32_0 : i32, i32
  }
  func.func @transform_8(%arg0: i32) -> (i32, i32) {
    %c0_i32 = arith.constant 0 : i32
    %c0_i32_0 = arith.constant 0 : i32
    %c0_i32_1 = arith.constant 0 : i32
    return %c0_i32, %c0_i32_0 : i32, i32
  }
  func.func @transform_9(%arg0: i32) -> (i32, i32) {
    %c0_i32 = arith.constant 0 : i32
    %c0_i32_0 = arith.constant 0 : i32
    %c0_i32_1 = arith.constant 0 : i32
    return %c0_i32, %c0_i32_0 : i32, i32
  }
  func.func @transform_10(%arg0: i32) -> (i32, i32) {
    %c0_i32 = arith.constant 0 : i32
    %c0_i32_0 = arith.constant 0 : i32
    %c0_i32_1 = arith.constant 0 : i32
    return %c0_i32, %c0_i32_0 : i32, i32
  }
  func.func @transform_11(%arg0: i32) -> (i32, i32) {
    %c0_i32 = arith.constant 0 : i32
    %c0_i32_0 = arith.constant 0 : i32
    %c0_i32_1 = arith.constant 0 : i32
    return %c0_i32, %c0_i32_0 : i32, i32
  }
  func.func @transform_12(%arg0: i32) -> (i32, i32) {
    %c0_i32 = arith.constant 0 : i32
    %c0_i32_0 = arith.constant 0 : i32
    %c0_i32_1 = arith.constant 0 : i32
    return %c0_i32, %c0_i32_0 : i32, i32
  }
  func.func @transform_13(%arg0: i32) -> (i32, i32) {
    %c0_i32 = arith.constant 0 : i32
    %c0_i32_0 = arith.constant 0 : i32
    %c0_i32_1 = arith.constant 0 : i32
    return %c0_i32, %c0_i32_0 : i32, i32
  }
  func.func @transform_14(%arg0: i32) -> (i32, i32) {
    %c0_i32 = arith.constant 0 : i32
    %c0_i32_0 = arith.constant 0 : i32
    %c0_i32_1 = arith.constant 0 : i32
    return %c0_i32, %c0_i32_0 : i32, i32
  }
  func.func @transform_15(%arg0: i32) -> (i32, i32) {
    %c0_i32 = arith.constant 0 : i32
    %c0_i32_0 = arith.constant 0 : i32
    %c0_i32_1 = arith.constant 0 : i32
    return %c0_i32, %c0_i32_0 : i32, i32
  }
  func.func @transform_16(%arg0: i32) -> (i32, i32) {
    %c0_i32 = arith.constant 0 : i32
    %c0_i32_0 = arith.constant 0 : i32
    %c0_i32_1 = arith.constant 0 : i32
    return %c0_i32, %c0_i32_0 : i32, i32
  }
  func.func @transform_17(%arg0: i32) -> (i32, i32) {
    %c0_i32 = arith.constant 0 : i32
    %c0_i32_0 = arith.constant 0 : i32
    return %arg0, %c0_i32 : i32, i32
  }
  func.func @transform_18(%arg0: i32) -> (i32, i32) {
    %c0_i32 = arith.constant 0 : i32
    %c0_i32_0 = arith.constant 0 : i32
    return %arg0, %c0_i32 : i32, i32
  }
}

</mosaic_0001>

<bundles_post_ra>
// kernel: tpu_custom_call.1
= control target key start
LH: loop header
LB: loop body
LE: loop exit
PB: predicated region body
PF: predicated region fallthrough
CT: control target
= control target key end

     0   :  { %s2427_s0 = inlined_call_operand.vmem [shape: s32[8,1,1], index: 0, kind: input, shape index: {}]   ;;  %s2428_s1 = inlined_call_operand.vmem [shape: s32[8,1,1], index: 1, kind: input, shape index: {}]   ;;  %s2429_s2 = inlined_call_operand.vmem [shape: bf16[8,32], index: 2, kind: input, shape index: {}]   ;;  %s2430_s3 = inlined_call_operand.vmem [shape: bf16[64,32], index: 3, kind: input, shape index: {}]   ;;  %s2431_s4 = inlined_call_operand.vmem [shape: bf16[64,32], index: 4, kind: input, shape index: {}]   ;;  %s2432_s5 = inlined_call_operand.vmem [shape: f32[32,4], index: 5, kind: input, shape index: {}]   ;;  %s2433_s6 = inlined_call_operand.vmem [shape: f32[4,32], index: 6, kind: input, shape index: {}]   ;;  %s2434_s7 = inlined_call_operand.vmem [shape: f32[64,8], index: 7, kind: input, shape index: {}]   ;;  %s2435_s8 = inlined_call_operand.vmem [shape: f32[8,64], index: 8, kind: input, shape index: {}]   ;;  %s2436_s9 = inlined_call_operand.vmem [shape: bf16[32,32], index: 9, kind: input, shape index: {}]   ;;  %s2437_s10 = inlined_call_operand.vmem [shape: f32[1,32], index: 10, kind: input, shape index: {}]   ;;  %s2438_s11 = inlined_call_operand.vmem [shape: bf16[32,32], index: 11, kind: input, shape index: {}]   ;;  %s2439_s12 = inlined_call_operand.vmem [shape: f32[1,32], index: 12, kind: input, shape index: {}]   ;;  %s2440_s13 = inlined_call_operand.vmem [shape: bf16[32,32], index: 13, kind: input, shape index: {}]   ;;  %s2441_s14 = inlined_call_operand.vmem [shape: f32[1,32], index: 14, kind: input, shape index: {}]   ;;  %s2442_s15 = inlined_call_operand.vmem [shape: bf16[32,32], index: 15, kind: input, shape index: {}]   ;;  %s2443_s16 = inlined_call_operand.vmem [shape: f32[1,32], index: 16, kind: input, shape index: {}]   ;;  %s2444_s17 = inlined_call_operand.hbm [shape: f32[8,32], index: 17, kind: output, shape index: {0}]   ;;  %s2445_s18 = inlined_call_operand.hbm [shape: f32[8,8], index: 18, kind: output, shape index: {1}]  }
   0x1   :  { %2448 = sst [smem:[#allocation8_spill]] %s2427_s0 }
   0x2   :  { %2449 = sst [smem:[#allocation9_spill]] %s2428_s1 }
   0x3   :  { %2450 = sst [smem:[#allocation10_spill]] %s2429_s2 }
   0x4   :  { %24 = vsyncpa [#allocation3], 0  ;;  %v1775_v0 = vld [vmem:[%s2436_s9] sm:$0xff]   ;;  %v1871_v1 = vmov 0.0   ;;  %v1776_v2 = vld [vmem:[%s2436_s9 + $0x8] sm:$0xff]   ;;  %vm1872_vm0 = vmmov 0  }
   0x5   :  { %1640 = vmatprep.subr.bf16.mxu0 %v1871_v1  ;;  %1644 = vmatprep.mubr.msk.bf16.mxu0 %vm1872_vm0, %v1871_v1  ;;  %v1777_v3 = vld [vmem:[%s2438_s11] sm:$0xff]   ;;  %s2451_s21 = sld [smem:[#allocation10_spill]]  ;;  %v1778_v5 = vld [vmem:[%s2438_s11 + $0x8] sm:$0xff]   ;;  %vm85_vm1 = vcmask 261120   ;;  %v1781_v8 = vld [vmem:[%s2430_s3 + $0x10] sm:$0xff]  }
   0x6   :  { %1641 = vmatpush3.bf16.msra.mxu0 %v1775_v0  ;;  %1648 = vmatprep.subr.bf16.mxu1 %v1777_v3  ;;  %v1779_v6 = vld [vmem:[%s2430_s3] sm:$0xff]   ;;  %v1780_v7 = vld [vmem:[%s2430_s3 + $0x8] sm:$0xff]  }
   0x7   :  { %1642 = vmatprep.subr.bf16.mxu0 %v1871_v1  ;;  %1649 = vmatpush3.bf16.msra.mxu1 %v1777_v3 }
   0x8   :  { %1650 = vmatprep.subr.bf16.mxu1 %v1778_v5  ;;  %1652 = vmatprep.mubr.msk.bf16.mxu1 %vm85_vm1, %v1779_v6 }
   0xa   :  { %1643 = vmatpush3.bf16.msra.mxu0 %v1776_v2 }
   0xb   :  { %v61_v4 = vld [vmem:[%s2451_s21] sm:$0xf]  ;;  %1651 = vmatpush3.bf16.msra.mxu1 %v1778_v5 }
   0xd   :  { %1645 = vmatmul.mubr.msk.bf16.vlgmr.msra.gmra.mrb[0].mxu0 %vm85_vm1, %v61_v4 }
   0xe   :  { %1653 = vmatmul.mubr.msk.bf16.vlgmr.msra.gmra.mrb[0].mxu1 %vm85_vm1, %v1780_v7 }
   0xf   :  { %1656 = vmatprep.mubr.msk.bf16.mxu1 %vm85_vm1, %v1781_v8 }
  0x10   :  { %25 = vsyncpa [#allocation5], 0  ;;  %v1782_v9 = vld [vmem:[%s2430_s3 + $0x18] sm:$0xff]   ;;  %v385_v10 = vld [vmem:[%s2434_s7] sm:$0xff]  ;;  %vm393_vm2 = vcmask 64512   ;;  %v672_v44 = vlaneseq  ;;  %s2452_s28 = sld [smem:[#allocation8_spill]] }
  0x11   :  { %v1783_v11 = vld [vmem:[%s2440_s13] sm:$0xff]   ;;  %v1784_v12 = vld [vmem:[%s2440_s13 + $0x8] sm:$0xff]   ;;  %v1787_v18 = vld [vmem:[%s2431_s4 + $0x10] sm:$0xff]   ;;  %s2453_s0 = sld [smem:[#allocation9_spill]]  ;;  %v1873_v47 = vmov 0   ;;  %vm834_vm3 = vcmask 7168  }
  0x12   :  { %v1785_v13 = vld [vmem:[%s2431_s4] sm:$0xff]   ;;  %1660 = vmatprep.subr.bf16.mxu0 %v1783_v11  ;;  %v532_v15 = vld [vmem:[%s2432_s5 + $0x8] sm:$0xff]  ;;  %v1788_v19 = vld [vmem:[%s2431_s4 + $0x18] sm:$0xff]   ;;  %1773 = vset.pattern.permute.xlu0 %v1873_v47  ;;  %v2112_v51 = vshrl.u32 %v672_v44, 7  ;;  %s1875_s13 = smov [#allocation4]  }
  0x13   :  { %1664 = vmatprep.mubr.msk.bf16.mxu0 %vm85_vm1, %v1785_v13  ;;  %v531_v14 = vld [vmem:[%s2432_s5] sm:$0xff]  ;;  %1661 = vmatpush3.bf16.msra.mxu0 %v1783_v11  ;;  %v1786_v17 = vld [vmem:[%s2431_s4 + $0x8] sm:$0xff]   ;;  %v387_v27 = vld [vmem:[%s2434_s7 + $0x10] sm:$0xff]  ;;  %s1491_s25 = sshll.u32 %s1875_s13, 4  ;;  %s1492_s25 = int_to_ptr.vmem [resolvable:$true] %s1491_s25 }
  0x14   :  { %1662 = vmatprep.subr.bf16.mxu0 %v1784_v12  ;;  %v1747_v16 = vpack.c.bf16 %v532_v15, %v531_v14  ;;  %v1503_v20 = vld [vmem:[%s2437_s10] ss:$0 sm:$0xff]  ;;  %v386_v25 = vld [vmem:[%s2434_s7 + $0x8] sm:$0xff]  ;;  %v388_v31 = vld [vmem:[%s2434_s7 + $0x18] sm:$0xff]  ;;  %1774 = vset.pattern.permute.xlu1 %v1873_v47  ;;  %s1823_s26 = scalar_lea.vmem %s1492_s25, 128  ;;  %p1828_p1 = scmp.lt.s32.totalorder %s1492_s25, %s1492_s25 }
  0x15   :  { %v389_v33 = vld [vmem:[%s2434_s7 + $0x20] sm:$0xff]  ;;  %v390_v34 = vld [vmem:[%s2434_s7 + $0x28] sm:$0xff]  ;;  %v391_v35 = vld [vmem:[%s2434_s7 + $0x30] sm:$0xff]  ;;  %p1824_p0 = scmp.ne.s32.totalorder %s1492_s25, %s1823_s26  ;;  %p1829_p2 = scmp.lt.s32.totalorder %s1823_s26, %s1823_s26 }
  0x16   :  { %1657 = vmatmul.mubr.msk.bf16.gmra.mrb[4].mxu1 %vm85_vm1, %v1782_v9  ;;  %v392_v39 = vld [vmem:[%s2434_s7 + $0x38] sm:$0xff]  ;;  %v533_v41 = vld [vmem:[%s2432_s5 + $0x10] sm:$0xff]  ;;  %v1545_v45 = vld [vmem:[%s2452_s28] ss:$0 sm:$0xff] }
  0x17   :  { %1674 = vmatprep.mubr.msk.f32.mxu1 %vm393_vm2, %v385_v10  ;;  %1663 = vmatpush3.bf16.msra.mxu0 %v1784_v12  ;;  %v534_v42 = vld [vmem:[%s2432_s5 + $0x18] sm:$0xff]  ;;  %v1553_v46 = vld [vmem:[%s2453_s0] ss:$0 sm:$0xff]  ;;  %v1548_v48 = vld [vmem:[%s2452_s28 + $0x3] ss:$0 sm:$0xff]  ;;  %vm714_vm4 = vcmp.lt.s32.totalorder %v2112_v51, %v1545_v45  ;;  %p1830_p3 = por %p1829_p2, %p1828_p1 }
  0x18   :  { %1748 = vmatprep.subr.bf16.mxu0 %v1747_v16  ;;  %v1751_v43 = vpack.c.bf16 %v534_v42, %v533_v41  ;;  %v1556_v49 = vld [vmem:[%s2453_s0 + $0x3] ss:$0 sm:$0xff]  ;;  %v1546_v50 = vld [vmem:[%s2452_s28 + $0x1] ss:$0 sm:$0xff]  ;;  %v1550_v53 = vld [vmem:[%s2452_s28 + $0x5] ss:$0 sm:$0xff]  ;;  %vm762_vm5 = vcmp.gt.s32.totalorder %v2112_v51, %v1553_v46  ;;  %vm717_vm6 = vcmp.lt.s32.totalorder %v2112_v51, %v1548_v48 }
  0x19   :  { %v1554_v52 = vld [vmem:[%s2453_s0 + $0x1] ss:$0 sm:$0xff]  ;;  %v1558_v54 = vld [vmem:[%s2453_s0 + $0x5] ss:$0 sm:$0xff]  ;;  %v1547_v55 = vld [vmem:[%s2452_s28 + $0x2] ss:$0 sm:$0xff]  ;;  %vm765_vm7 = vcmp.gt.s32.totalorder %v2112_v51, %v1556_v49  ;;  %vm715_vm9 = vcmp.lt.s32.totalorder %v2112_v51, %v1546_v50  ;;  %vm719_vm11 = vcmp.lt.s32.totalorder %v2112_v51, %v1550_v53  ;;  %p1831_p4 = pnand %p1830_p3, %p1824_p0 }
  0x1a   :  { %1665 = vmatmul.mubr.msk.bf16.vlgmr.msra.gmra.mrb[4].mxu0 %vm85_vm1, %v1786_v17  ;;  %v1555_v56 = vld [vmem:[%s2453_s0 + $0x2] ss:$0 sm:$0xff]  ;;  %v1549_v57 = vld [vmem:[%s2452_s28 + $0x4] ss:$0 sm:$0xff]  ;;  %vm770_vm8 = vmor %vm714_vm4, %vm762_vm5  ;;  %vm763_vm10 = vcmp.gt.s32.totalorder %v2112_v51, %v1554_v52  ;;  %vm767_vm12 = vcmp.gt.s32.totalorder %v2112_v51, %v1558_v54  ;;  %vm716_vm14 = vcmp.lt.s32.totalorder %v2112_v51, %v1547_v55 }
  0x1b   :  { %1668 = vmatprep.mubr.msk.bf16.mxu0 %vm85_vm1, %v1787_v18  ;;  %1750 = vmatpush3.bf16.msra.mxu0 %v1747_v16  ;;  %v778_v58 = vsel %vm770_vm8, 1, %v1873_v47  ;;  %v1561_v59 = vsel %vm770_vm8, 1.0, %v1871_v1  ;;  %vm773_vm13 = vmor %vm717_vm6, %vm765_vm7  ;;  %vm764_vm15 = vcmp.gt.s32.totalorder %v2112_v51, %v1555_v56  ;;  %vm718_vm5 = vcmp.lt.s32.totalorder %v2112_v51, %v1549_v57  ;;  %v1557_v4 = vld [vmem:[%s2453_s0 + $0x4] ss:$0 sm:$0xff]  ;;  %v1551_v9 = vld [vmem:[%s2452_s28 + $0x6] ss:$0 sm:$0xff] }
  0x1c   :  { %1752 = vmatprep.subr.bf16.mxu0 %v1751_v43  ;;  %787 = vperm.xlu0 %1773, %v778_v58   ;;  %v835_v60 = vsel %vm834_vm3, %v1561_v59, inf  ;;  %v781_v61 = vsel %vm773_vm13, 1, %v1873_v47  ;;  %v1564_v62 = vsel %vm773_vm13, 1.0, %v1871_v1  ;;  %vm771_vm4 = vmor %vm715_vm9, %vm763_vm10  ;;  %vm766_vm8 = vcmp.gt.s32.totalorder %v2112_v51, %v1557_v4  ;;  %v1559_v17 = vld [vmem:[%s2453_s0 + $0x6] ss:$0 sm:$0xff] }
  0x1d   :  { %v836_v63 = vrot.slane %v835_v60, 4  ;;  %796 = vperm.xlu1 %1774, %v781_v61   ;;  %v856_v0 = vsel %vm834_vm3, %v1564_v62, inf  ;;  %v779_v2 = vsel %vm771_vm4, 1, %v1873_v47  ;;  %v1562_v3 = vsel %vm771_vm4, 1.0, %v1871_v1  ;;  %vm775_vm6 = vmor %vm719_vm11, %vm767_vm12  ;;  %v1552_v56 = vld [vmem:[%s2452_s28 + $0x7] ss:$0 sm:$0xff] }
  0x1e   :  { %v857_v5 = vrot.slane %v856_v0, 4  ;;  %v842_v6 = vsel %vm834_vm3, %v1562_v3, inf  ;;  %v783_v7 = vsel %vm775_vm6, 1, %v1873_v47  ;;  %v1566_v8 = vsel %vm775_vm6, 1.0, %v1871_v1  ;;  %vm772_vm7 = vmor %vm716_vm14, %vm764_vm15 }
  0x1f   :  { %1754 = vmatpush3.bf16.msra.mxu0 %v1751_v43  ;;  %v837_v10 = vmin.f32 %v835_v60, %v836_v63  ;;  %v843_v11 = vrot.slane %v842_v6, 4  ;;  %v870_v12 = vsel %vm834_vm3, %v1566_v8, inf  ;;  %v780_v13 = vsel %vm772_vm7, 1, %v1873_v47  ;;  %vm2178_vm9 = vmor %vm718_vm5, %vm766_vm8  ;;  %v1560_v63 = vld [vmem:[%s2453_s0 + $0x7] ss:$0 sm:$0xff] }
  0x20   :  { %1739 = vmatprep.subr.bf16.mxu0 %v1871_v1  ;;  %v858_v14 = vmin.f32 %v856_v0, %v857_v5  ;;  %790 = vperm.xlu0 %1773, %v779_v2   ;;  %v871_v15 = vrot.slane %v870_v12, 4  ;;  %v1563_v16 = vsel %vm772_vm7, 1.0, %v1871_v1  ;;  %vm720_vm10 = vcmp.lt.s32.totalorder %v2112_v51, %v1551_v9 }
  0x21   :  { %v838_v18 = vrot.slane %v837_v10, 2  ;;  %802 = vperm.xlu1 %1774, %v783_v7   ;;  %vm768_vm11 = vcmp.gt.s32.totalorder %v2112_v51, %v1559_v17  ;;  %v782_v42 = vsel %vm2178_vm9, 1, %v1873_v47  ;;  %vm721_vm14 = vcmp.lt.s32.totalorder %v2112_v51, %v1552_v56 }
  0x22   :  { %1669 = vmatmul.mubr.msk.bf16.gmra.mrb[8].mxu0 %vm85_vm1, %v1788_v19  ;;  %v844_v19 = vmin.f32 %v842_v6, %v843_v11  ;;  %vm2188_vm12 = vmor %vm720_vm10, %vm768_vm11  ;;  %vm769_vm4 = vcmp.gt.s32.totalorder %v2112_v51, %v1560_v63  ;;  %vm1125_vm11 = vcmask 1043456  }
  0x23   :  { %v1567_v50 = vsel %vm2188_vm12, 1.0, %v1871_v1  ;;  %vm2209_vm6 = vmor %vm721_vm14, %vm769_vm4 }
  0x24   :  { %793 = vperm.xlu0 %1773, %v780_v13   ;;  %v877_v55 = vsel %vm834_vm3, %v1567_v50, inf  ;;  %v1568_v11 = vsel %vm2209_vm6, 1.0, %v1871_v1 }
  0x25   :  { %v878_v59 = vrot.slane %v877_v55, 4 }
  0x27   :  { %v879_v4 = vmin.f32 %v877_v55, %v878_v59 }
  0x28   :  { %799 = vperm.xlu0 %1773, %v782_v42  }
  0xe0   :  { %v123_v21 = vpop.f32.mrb[0].mxu0 }
  0xe1   :  { %v124_v22 = vadd.f32 %v1503_v20, %v123_v21  ;;  %v1646_v23 = vpop.f32.mrb[1].mxu0  ;;  %v2049_v28 = vpop.f32.mrb[0].mxu1  ;;  %v849_v20 = vsel %vm834_vm3, %v1563_v16, inf }
  0xe2   :  { %v126_v24 = vpop.f32.mrb[2].mxu0  ;;  %v2051_v29 = vpop.f32.mrb[1].mxu1  ;;  %v872_v23 = vmin.f32 %v870_v12, %v871_v15 }
  0xe3   :  { %v1647_v26 = vpop.f32.mrb[3].mxu0  ;;  %1672 = vmatprep.subr.mxu1 %v124_v22  ;;  %v2054_v30 = vpop.f32.mrb[2].mxu1  ;;  %v850_v24 = vrot.slane %v849_v20, 4 }
  0xe4   :  { %1673 = vmatpush3.msra.mxu1 %v124_v22  ;;  %v2060_v32 = vpop.f32.mrb[3].mxu1  ;;  %v859_v22 = vrot.slane %v858_v14, 2  ;;  %v1565_v26 = vsel %vm2178_vm9, 1.0, %v1871_v1 }
  0xe5   :  { %1675 = vmatmul.mubr.msk.f32.vlgmr.msra.gmra.mrb[8].mxu1 %vm393_vm2, %v386_v25  ;;  %v839_v25 = vmin.f32 %v837_v10, %v838_v18  ;;  %v880_v10 = vrot.slane %v879_v4, 2 }
  0xe6   :  { %1677 = vmatprep.mubr.msk.f32.mxu1 %vm393_vm2, %v387_v27  ;;  %v845_v27 = vrot.slane %v844_v19, 2 }
  0xe7   :  { %v840_v41 = vrot.slane %v839_v25, 1  ;;  %v881_v15 = vmin.f32 %v879_v4, %v880_v10 }
  0xe8   :  { %v846_v45 = vmin.f32 %v844_v19, %v845_v27 }
  0xe9   :  { %1678 = vmatmul.mubr.msk.f32.gmra.mrb[10].mxu1 %vm393_vm2, %v388_v31  ;;  %v2073_v36 = vpop.f32.mrb[4].mxu1  ;;  %v851_v31 = vmin.f32 %v849_v20, %v850_v24  ;;  %v841_v52 = vmin.f32 %v839_v25, %v840_v41  ;;  %v882_v18 = vrot.slane %v881_v15, 1 }
  0xea   :  { %1680 = vmatprep.mubr.msk.f32.mxu1 %vm393_vm2, %v389_v33  ;;  %v2075_v37 = vpop.f32.mrb[5].mxu1  ;;  %v863_v33 = vsel %vm834_vm3, %v1565_v26, inf  ;;  %v847_v54 = vrot.slane %v846_v45, 1  ;;  %v784_v26 = vsel %vm2188_vm12, 1, %v1873_v47 }
  0xeb   :  { %v2078_v38 = vpop.f32.mrb[6].mxu1  ;;  %v864_v43 = vrot.slane %v863_v33, 4  ;;  %v852_v46 = vrot.slane %v851_v31, 2  ;;  %vm891_vm13 = vcmp.gt.f32.partialorder %v841_v52, 0.5  ;;  %v883_v21 = vmin.f32 %v881_v15, %v882_v18 }
  0xec   :  { %v2084_v40 = vpop.f32.mrb[7].mxu1  ;;  %v848_v60 = vmin.f32 %v846_v45, %v847_v54  ;;  %v899_v0 = vsel %vm891_vm13, 1, %v1873_v47 }
  0xed   :  { %1681 = vmatmul.mubr.msk.f32.gmra.mrb[12].mxu1 %vm393_vm2, %v390_v34  ;;  %v860_v34 = vmin.f32 %v858_v14, %v859_v22  ;;  %v865_v53 = vmin.f32 %v863_v33, %v864_v43  ;;  %v853_v57 = vmin.f32 %v851_v31, %v852_v46  ;;  %908 = vperm.xlu1 %1774, %v899_v0   ;;  %v884_v14 = vsel %vm834_vm3, %v1568_v11, inf  ;;  %v2220_v22 = vpop.f32.mrb[4].mxu0 }
  0xee   :  { %1683 = vmatprep.mubr.msk.f32.mxu1 %vm393_vm2, %v391_v35  ;;  %v873_v35 = vrot.slane %v872_v23, 2  ;;  %vm892_vm15 = vcmp.gt.f32.partialorder %v848_v60, 0.5  ;;  %v885_v17 = vrot.slane %v884_v14, 4  ;;  %v2223_v25 = vpop.f32.mrb[5].mxu0  ;;  %vm897_vm3 = vcmp.gt.f32.partialorder %v883_v21, 0.5 }
  0xef   :  { %v861_v48 = vrot.slane %v860_v34, 1  ;;  %v866_v61 = vrot.slane %v865_v53, 2  ;;  %v854_v2 = vrot.slane %v853_v57, 1  ;;  %v900_v5 = vsel %vm892_vm15, 1, %v1873_v47  ;;  %v2228_v31 = vpop.f32.mrb[6].mxu0 }
  0xf0   :  { %v874_v49 = vmin.f32 %v872_v23, %v873_v35  ;;  %v886_v20 = vmin.f32 %v884_v14, %v885_v17  ;;  %v785_v33 = vsel %vm2209_vm6, 1, %v1873_v47  ;;  %v2233_v35 = vpop.f32.mrb[7].mxu0  ;;  %v905_v41 = vsel %vm897_vm3, 1, %v1873_v47 }
  0xf1   :  { %1684 = vmatmul.mubr.msk.f32.gmra.mrb[14].mxu1 %vm393_vm2, %v392_v39  ;;  %v862_v58 = vmin.f32 %v860_v34, %v861_v48  ;;  %v867_v3 = vmin.f32 %v865_v53, %v866_v61  ;;  %v855_v6 = vmin.f32 %v853_v57, %v854_v2  ;;  %911 = vperm.xlu1 %1774, %v900_v5   ;;  %vm947_vm15 = vcmask 31744  }
  0xf2   :  { %v875_v62 = vrot.slane %v874_v49, 1  ;;  %v887_v24 = vrot.slane %v886_v20, 2 }
  0xf3   :  { %vm894_vm5 = vcmp.gt.f32.partialorder %v862_v58, 0.5  ;;  %v868_v7 = vrot.slane %v867_v3, 1  ;;  %vm893_vm7 = vcmp.gt.f32.partialorder %v855_v6, 0.5 }
  0xf4   :  { %v876_v8 = vmin.f32 %v874_v49, %v875_v62  ;;  %v901_v12 = vsel %vm893_vm7, 1, %v1873_v47  ;;  %v902_v16 = vsel %vm894_vm5, 1, %v1873_v47  ;;  %v888_v27 = vmin.f32 %v886_v20, %v887_v24  ;;  %v1507_v49 = vld [vmem:[%s2439_s12] ss:$0 sm:$0xff] }
  0xf5   :  { %v869_v13 = vmin.f32 %v867_v3, %v868_v7  ;;  %914 = vperm.xlu0 %1773, %v901_v12   ;;  %917 = vperm.xlu1 %1774, %v902_v16   ;;  %v2236_v42 = vpop.f32.mrb[8].mxu0  ;;  %v230_v50 = vadd.f32 %v1507_v49, %v2060_v32  ;;  %v227_v52 = vadd.f32 %v1507_v49, %v2051_v29 }
  0xf6   :  { %vm896_vm9 = vcmp.gt.f32.partialorder %v876_v8, 0.5  ;;  %v889_v34 = vrot.slane %v888_v27, 1  ;;  %v2238_v39 = vpop.f32.mrb[9].mxu0  ;;  %v238_v57 = vadd.f32 %v2054_v30, %v1507_v49  ;;  %v235_v58 = vadd.f32 %v2049_v28, %v1507_v49 }
  0xf7   :  { %vm895_vm8 = vcmp.gt.f32.partialorder %v869_v13, 0.5  ;;  %v904_v23 = vsel %vm896_vm9, 1, %v1873_v47  ;;  %v2240_v45 = vpop.f32.mrb[10].mxu0  ;;  %v246_v32 = vadd.f32 %v1507_v49, %v2084_v40  ;;  %v243_v29 = vadd.f32 %v1507_v49, %v2075_v37  ;;  %v788_v40 = vpop.permute.xlu0 %787 }
  0xf8   :  { %v903_v19 = vsel %vm895_vm8, 1, %v1873_v47  ;;  %v890_v43 = vmin.f32 %v888_v27, %v889_v34  ;;  %v2242_v46 = vpop.f32.mrb[11].mxu0  ;;  %v254_v30 = vadd.f32 %v2078_v38, %v1507_v49  ;;  %v251_v2 = vadd.f32 %v2073_v36, %v1507_v49  ;;  %v1100_v38 = vld [vmem:[%s2433_s6] sm:$0xf]  ;;  %v797_v36 = vpop.permute.xlu1 %796 }
  0xf9   :  { %920 = vperm.xlu0 %1773, %v903_v19   ;;  %923 = vperm.xlu1 %1774, %v904_v23   ;;  %vm810_vm12 = vcmp.eq.s32.totalorder %v788_v40, 1  ;;  %vm813_vm13 = vcmp.eq.s32.totalorder %v797_v36, 1 }
  0xfa   :  { %vm898_vm10 = vcmp.gt.f32.partialorder %v890_v43, 0.5  ;;  %1706 = vmatprep.subr.msk.mxu1 %vm1125_vm11, %v1100_v38 }
  0xfb   :  { %v906_v48 = vsel %vm898_vm10, 1, %v1873_v47  ;;  %1707 = vmatpush3.msk.msra.mxu1 %vm1125_vm11, %v1100_v38  ;;  %v791_v7 = vpop.permute.xlu0 %790 }
  0xfc   :  { %v803_v6 = vpop.permute.xlu1 %802  ;;  %vm811_vm14 = vcmp.eq.s32.totalorder %v791_v7, 1 }
  0xfd   :  { %805 = vperm.xlu0 %1773, %v784_v26   ;;  %808 = vperm.xlu1 %1774, %v785_v33   ;;  %vm815_vm4 = vcmp.eq.s32.totalorder %v803_v6, 1 }
  0xff   :  { %v794_v9 = vpop.permute.xlu0 %793 }
 0x100   :  { %vm812_vm5 = vcmp.eq.s32.totalorder %v794_v9, 1 }
 0x101   :  { %926 = vperm.xlu0 %1773, %v905_v41   ;;  %929 = vperm.xlu1 %1774, %v906_v48  }
 0x103   :  { %v800_v11 = vpop.permute.xlu0 %799 }
 0x104   :  { %vm814_vm8 = vcmp.eq.s32.totalorder %v800_v11, 1 }
 0x16c   :  { %v909_v8 = vpop.permute.xlu1 %908 }
 0x16d   :  { %vm931_vm7 = vcmp.eq.s32.totalorder %v909_v8, 1 }
 0x170   :  { %v912_v10 = vpop.permute.xlu1 %911 }
 0x171   :  { %vm932_vm6 = vcmp.eq.s32.totalorder %v912_v10, 1 }
 0x174   :  { %v918_v12 = vpop.permute.xlu1 %917  ;;  %v915_v13 = vpop.permute.xlu0 %914 }
 0x175   :  { %vm933_vm9 = vcmp.eq.s32.totalorder %v915_v13, 1  ;;  %vm934_vm3 = vcmp.eq.s32.totalorder %v918_v12, 1 }
 0x178   :  { %v924_v14 = vpop.permute.xlu1 %923  ;;  %v2269_v15 = vpop.permute.xlu0 %920 }
 0x179   :  { %vm935_vm10 = vcmp.eq.s32.totalorder %v2269_v15, 1  ;;  %vm936_vm11 = vcmp.eq.s32.totalorder %v924_v14, 1 }
 0x17c   :  { %v2271_v19 = vpop.permute.xlu1 %808  ;;  %v2275_v27 = vpop.permute.xlu0 %805 }
 0x1b8   :  { %v1676_v53 = vpop.f32.mrb[8].mxu1 }
 0x1b9   :  { %v524_v54 = vmul.f32 %v1676_v53, %v230_v50  ;;  %v484_v55 = vpop.f32.mrb[9].mxu1 }
 0x1ba   :  { %v523_v56 = vmul.f32 %v484_v55, %v227_v52  ;;  %v930_v55 = vpop.permute.xlu1 %929 }
 0x1bc   :  { %v1679_v59 = vpop.f32.mrb[10].mxu1  ;;  %1694 = vmatprep.mubr.msk.f32.mxu0 %vm85_vm1, %v523_v56 }
 0x1bd   :  { %v526_v47 = vmul.f32 %v1679_v59, %v238_v57  ;;  %v494_v60 = vpop.f32.mrb[11].mxu1  ;;  %1695 = vmatmul.mubr.msk.f32.vlgmr.msra.gmra.mrb[12].mxu0 %vm85_vm1, %v524_v54 }
 0x1be   :  { %v525_v61 = vmul.f32 %v494_v60, %v235_v58 }
 0x1c0   :  { %v1682_v62 = vpop.f32.mrb[12].mxu1  ;;  %1697 = vmatprep.mubr.msk.f32.mxu0 %vm85_vm1, %v525_v61 }
 0x1c1   :  { %v528_v63 = vmul.f32 %v1682_v62, %v246_v32  ;;  %v504_v0 = vpop.f32.mrb[13].mxu1  ;;  %1698 = vmatmul.mubr.msk.f32.gmra.mrb[14].mxu0 %vm85_vm1, %v526_v47 }
 0x1c2   :  { %v527_v28 = vmul.f32 %v504_v0, %v243_v29 }
 0x1c4   :  { %v1685_v3 = vpop.f32.mrb[14].mxu1  ;;  %1700 = vmatprep.mubr.msk.f32.mxu0 %vm85_vm1, %v527_v28  ;;  %v927_v28 = vpop.permute.xlu0 %926 }
 0x1c5   :  { %v530_v4 = vmul.f32 %v1685_v3, %v254_v30  ;;  %v514_v5 = vpop.f32.mrb[15].mxu1  ;;  %1701 = vmatmul.mubr.msk.f32.gmra.mrb[16].mxu0 %vm85_vm1, %v528_v63 }
 0x1c6   :  { %v529_v37 = vmul.f32 %v514_v5, %v251_v2 }
 0x1c8   :  { %1703 = vmatprep.mubr.msk.f32.mxu0 %vm85_vm1, %v529_v37 }
 0x1c9   :  { %1704 = vmatmul.mubr.msk.f32.gmra.mrb[18].mxu0 %vm85_vm1, %v530_v4 }
 0x1ca   :  { %1743 = vmatprep.mubr.msk.bf16.mxu0 %vm1872_vm0, %v1871_v1 }
 0x290   :  { %v1696_v16 = vpop.f32.mrb[12].mxu0 }
 0x291   :  { %v665_v17 = vmul.f32 0.35355338, %v1696_v16  ;;  %v625_v18 = vpop.f32.mrb[13].mxu0 }
 0x292   :  { %v664_v20 = vmul.f32 0.35355338, %v625_v18 }
 0x293   :  { %v819_v21 = vsel %vm811_vm14, -inf, %v665_v17  ;;  %vm816_vm14 = vcmp.eq.s32.totalorder %v2275_v27, 1 }
 0x294   :  { %v2273_v23 = vsel %vm932_vm6, 1.0, %v819_v21  ;;  %v818_v24 = vsel %vm810_vm12, -inf, %v664_v20  ;;  %v1699_v26 = vpop.f32.mrb[14].mxu0  ;;  %vm817_vm12 = vcmp.eq.s32.totalorder %v2271_v19, 1  ;;  %vm1465_vm6 = vcmask 1044484  }
 0x295   :  { %v955_v33 = vsel %vm947_vm15, %v2273_v23, -inf  ;;  %v2279_v34 = vsel %vm931_vm7, 1.0, %v818_v24  ;;  %v667_v41 = vmul.f32 0.35355338, %v1699_v26  ;;  %v635_v43 = vpop.f32.mrb[15].mxu0  ;;  %vm1467_vm7 = vcmask 1045509  }
 0x296   :  { %v956_v48 = vrot.slane %v955_v33, 4  ;;  %v948_v49 = vsel %vm947_vm15, %v2279_v34, -inf  ;;  %v666_v50 = vmul.f32 0.35355338, %v635_v43 }
 0x297   :  { %v949_v52 = vrot.slane %v948_v49, 4  ;;  %v821_v53 = vsel %vm813_vm13, -inf, %v667_v41  ;;  %vm938_vm13 = vcmp.eq.s32.totalorder %v930_v55, 1 }
 0x298   :  { %v957_v54 = vmax.f32 %v955_v33, %v956_v48  ;;  %v2286_v56 = vsel %vm934_vm3, 1.0, %v821_v53  ;;  %v820_v57 = vsel %vm812_vm5, -inf, %v666_v50  ;;  %v1702_v58 = vpop.f32.mrb[16].mxu0  ;;  %vm937_vm5 = vcmp.eq.s32.totalorder %v927_v28, 1 }
 0x299   :  { %v950_v59 = vmax.f32 %v948_v49, %v949_v52  ;;  %v969_v47 = vsel %vm947_vm15, %v2286_v56, -inf  ;;  %v2292_v60 = vsel %vm933_vm9, 1.0, %v820_v57  ;;  %v669_v61 = vmul.f32 0.35355338, %v1702_v58  ;;  %v645_v32 = vpop.f32.mrb[17].mxu0 }
 0x29a   :  { %v958_v29 = vrot.slane %v957_v54, 2  ;;  %v970_v62 = vrot.slane %v969_v47, 4  ;;  %v962_v63 = vsel %vm947_vm15, %v2292_v60, -inf  ;;  %v668_v0 = vmul.f32 0.35355338, %v645_v32 }
 0x29b   :  { %v951_v30 = vrot.slane %v950_v59, 2  ;;  %v963_v2 = vrot.slane %v962_v63, 4  ;;  %v823_v3 = vsel %vm815_vm4, -inf, %v669_v61  ;;  %vm1463_vm4 = vcmask 1043459  }
 0x29c   :  { %v959_v4 = vmax.f32 %v957_v54, %v958_v29  ;;  %v971_v5 = vmax.f32 %v969_v47, %v970_v62  ;;  %v944_v37 = vsel %vm936_vm11, 1.0, %v823_v3  ;;  %v822_v38 = vsel %vm814_vm8, -inf, %v668_v0  ;;  %v1705_v36 = vpop.f32.mrb[18].mxu0 }
 0x29d   :  { %v952_v40 = vmax.f32 %v950_v59, %v951_v30  ;;  %v964_v7 = vmax.f32 %v962_v63, %v963_v2  ;;  %v983_v8 = vsel %vm947_vm15, %v944_v37, -inf  ;;  %v943_v9 = vsel %vm935_vm10, 1.0, %v822_v38  ;;  %v655_v10 = vpop.f32.mrb[19].mxu0 }
 0x29e   :  { %v960_v12 = vrot.slane %v959_v4, 1  ;;  %v972_v6 = vrot.slane %v971_v5, 2  ;;  %v984_v13 = vrot.slane %v983_v8, 4  ;;  %v976_v16 = vsel %vm947_vm15, %v943_v9, -inf }
 0x29f   :  { %v953_v17 = vrot.slane %v952_v40, 1  ;;  %v965_v14 = vrot.slane %v964_v7, 2  ;;  %v977_v18 = vrot.slane %v976_v16, 4  ;;  %v671_v11 = vmul.f32 0.35355338, %v1705_v36 }
 0x2a0   :  { %v961_v20 = vmax.f32 %v959_v4, %v960_v12  ;;  %v973_v21 = vmax.f32 %v971_v5, %v972_v6  ;;  %v985_v24 = vmax.f32 %v983_v8, %v984_v13  ;;  %v670_v26 = vmul.f32 0.35355338, %v655_v10 }
 0x2a1   :  { %v954_v33 = vmax.f32 %v952_v40, %v953_v17  ;;  %v966_v41 = vmax.f32 %v964_v7, %v965_v14  ;;  %v978_v43 = vmax.f32 %v976_v16, %v977_v18  ;;  %v825_v15 = vsel %vm817_vm12, -inf, %v671_v11 }
 0x2a2   :  { %v1005_v48 = vsub.f32 %v2273_v23, %v961_v20  ;;  %v974_v49 = vrot.slane %v973_v21, 1  ;;  %v986_v50 = vrot.slane %v985_v24, 2  ;;  %v946_v52 = vsel %vm938_vm13, 1.0, %v825_v15 }
 0x2a3   :  { %v1004_v53 = vsub.f32 %v2279_v34, %v954_v33  ;;  %v967_v54 = vrot.slane %v966_v41, 1  ;;  %v979_v57 = vrot.slane %v978_v43, 2  ;;  %v997_v58 = vsel %vm947_vm15, %v946_v52, -inf }
 0x2a4   :  { %v1014_v59 = vmul.f32 1.442695, %v1005_v48  ;;  %v975_v47 = vmax.f32 %v973_v21, %v974_v49  ;;  %v987_v61 = vmax.f32 %v985_v24, %v986_v50  ;;  %v998_v32 = vrot.slane %v997_v58, 4 }
 0x2a5   :  { %v1012_v29 = vmul.f32 1.442695, %v1004_v53  ;;  %v968_v62 = vmax.f32 %v966_v41, %v967_v54  ;;  %v980_v19 = vmax.f32 %v978_v43, %v979_v57  ;;  %v824_v23 = vsel %vm816_vm14, -inf, %v670_v26 }
 0x2a6   :  { %1791 = vpow2.f32 %v1014_v59  ;;  %v1007_v55 = vsub.f32 %v2286_v56, %v975_v47  ;;  %v988_v63 = vrot.slane %v987_v61, 1  ;;  %v999_v0 = vmax.f32 %v997_v58, %v998_v32 }
 0x2a7   :  { %1793 = vpow2.f32 %v1012_v29  ;;  %v1006_v34 = vsub.f32 %v2292_v60, %v968_v62  ;;  %v981_v30 = vrot.slane %v980_v19, 1  ;;  %v945_v2 = vsel %vm937_vm5, 1.0, %v824_v23 }
 0x2a8   :  { %v1018_v3 = vmul.f32 1.442695, %v1007_v55  ;;  %v989_v4 = vmax.f32 %v987_v61, %v988_v63  ;;  %v1000_v5 = vrot.slane %v999_v0, 2  ;;  %v990_v38 = vsel %vm947_vm15, %v945_v2, -inf }
 0x2a9   :  { %v1016_v36 = vmul.f32 1.442695, %v1006_v34  ;;  %v982_v40 = vmax.f32 %v980_v19, %v981_v30  ;;  %v991_v27 = vrot.slane %v990_v38, 4  ;;  %vm1469_vm8 = vcmask 1046534  }
 0x2aa   :  { %1795 = vpow2.f32 %v1018_v3  ;;  %v1009_v7 = vsub.f32 %v944_v37, %v989_v4  ;;  %v1001_v8 = vmax.f32 %v999_v0, %v1000_v5  ;;  %vm1471_vm9 = vcmask 1047559  }
 0x2ab   :  { %1797 = vpow2.f32 %v1016_v36  ;;  %v1008_v56 = vsub.f32 %v943_v9, %v982_v40  ;;  %v992_v10 = vmax.f32 %v990_v38, %v991_v27 }
 0x2ac   :  { %v1022_v12 = vmul.f32 1.442695, %v1009_v7  ;;  %v1002_v6 = vrot.slane %v1001_v8, 1 }
 0x2ad   :  { %v1020_v60 = vmul.f32 1.442695, %v1008_v56  ;;  %v993_v13 = vrot.slane %v992_v10, 2 }
 0x2ae   :  { %1799 = vpow2.f32 %v1022_v12  ;;  %v1003_v28 = vmax.f32 %v1001_v8, %v1002_v6 }
 0x2af   :  { %1801 = vpow2.f32 %v1020_v60  ;;  %v994_v16 = vmax.f32 %v992_v10, %v993_v13 }
 0x2b0   :  { %v2316_v17 = vpop.eup %1791  ;;  %v1011_v14 = vsub.f32 %v946_v52, %v1003_v28 }
 0x2b1   :  { %v2318_v18 = vpop.eup %1793  ;;  %v1035_v37 = vsel %vm947_vm15, %v2316_v17, 0.0  ;;  %v995_v11 = vrot.slane %v994_v16, 1 }
 0x2b2   :  { %v1036_v20 = vrot.slane %v1035_v37, 4  ;;  %v1028_v9 = vsel %vm947_vm15, %v2318_v18, 0.0  ;;  %v1026_v21 = vmul.f32 1.442695, %v1011_v14 }
 0x2b3   :  { %v1029_v24 = vrot.slane %v1028_v9, 4  ;;  %v996_v26 = vmax.f32 %v994_v16, %v995_v11 }
 0x2b4   :  { %v2324_v33 = vpop.eup %1795  ;;  %v1037_v41 = vadd.f32 %v1036_v20, %v1035_v37  ;;  %1803 = vpow2.f32 %v1026_v21 }
 0x2b5   :  { %v2326_v43 = vpop.eup %1797  ;;  %v1030_v15 = vadd.f32 %v1029_v24, %v1028_v9  ;;  %v1049_v48 = vsel %vm947_vm15, %v2324_v33, 0.0  ;;  %v1010_v49 = vsub.f32 %v945_v2, %v996_v26 }
 0x2b6   :  { %v1050_v50 = vrot.slane %v1049_v48, 4  ;;  %v1042_v52 = vsel %vm947_vm15, %v2326_v43, 0.0  ;;  %v1038_v53 = vrot.slane %v1037_v41, 2 }
 0x2b7   :  { %v1031_v54 = vrot.slane %v1030_v15, 2  ;;  %v1043_v57 = vrot.slane %v1042_v52, 4  ;;  %v1024_v58 = vmul.f32 1.442695, %v1010_v49 }
 0x2b8   :  { %v2332_v59 = vpop.eup %1799  ;;  %v1051_v47 = vadd.f32 %v1050_v50, %v1049_v48  ;;  %v1039_v61 = vadd.f32 %v1038_v53, %v1037_v41 }
 0x2b9   :  { %v2334_v32 = vpop.eup %1801  ;;  %v1032_v29 = vadd.f32 %v1031_v54, %v1030_v15  ;;  %v1044_v62 = vadd.f32 %v1043_v57, %v1042_v52  ;;  %v1063_v19 = vsel %vm947_vm15, %v2332_v59, 0.0  ;;  %1805 = vpow2.f32 %v1024_v58 }
 0x2ba   :  { %v1064_v23 = vrot.slane %v1063_v19, 4  ;;  %v1056_v55 = vsel %vm947_vm15, %v2334_v32, 0.0  ;;  %v1040_v63 = vrot.slane %v1039_v61, 1  ;;  %v1052_v0 = vrot.slane %v1051_v47, 2 }
 0x2bb   :  { %v1045_v34 = vrot.slane %v1044_v62, 2  ;;  %v1057_v30 = vrot.slane %v1056_v55, 4  ;;  %v1033_v2 = vrot.slane %v1032_v29, 1 }
 0x2bc   :  { %v1065_v3 = vadd.f32 %v1064_v23, %v1063_v19  ;;  %v1041_v4 = vadd.f32 %v1040_v63, %v1039_v61  ;;  %v1053_v5 = vadd.f32 %v1052_v0, %v1051_v47 }
 0x2bd   :  { %v1046_v38 = vadd.f32 %v1045_v34, %v1044_v62  ;;  %v1058_v36 = vadd.f32 %v1057_v30, %v1056_v55  ;;  %v1034_v40 = vadd.f32 %v1033_v2, %v1032_v29 }
 0x2be   :  { %v2340_v27 = vpop.eup %1803  ;;  %v1066_v7 = vrot.slane %v1065_v3, 2  ;;  %1807 = vrcp.f32 %v1041_v4  ;;  %v1054_v8 = vrot.slane %v1053_v5, 1 }
 0x2bf   :  { %v1059_v56 = vrot.slane %v1058_v36, 2  ;;  %v1077_v10 = vsel %vm947_vm15, %v2340_v27, 0.0  ;;  %1809 = vrcp.f32 %v1034_v40  ;;  %v1047_v12 = vrot.slane %v1046_v38, 1 }
 0x2c0   :  { %v1067_v6 = vadd.f32 %v1066_v7, %v1065_v3  ;;  %v1078_v60 = vrot.slane %v1077_v10, 4  ;;  %v1055_v13 = vadd.f32 %v1054_v8, %v1053_v5  ;;  %v1790_v7 = vld [vmem:[%s2442_s15 + $0x8] sm:$0xff]   ;;  %v1426_v8 = vand.u32 127, %v672_v44 }
 0x2c1   :  { %v1060_v28 = vadd.f32 %v1059_v56, %v1058_v36  ;;  %v1048_v16 = vadd.f32 %v1047_v12, %v1046_v38 }
 0x2c2   :  { %v1079_v14 = vadd.f32 %v1078_v60, %v1077_v10  ;;  %1811 = vrcp.f32 %v1055_v13  ;;  %v1068_v37 = vrot.slane %v1067_v6, 1  ;;  %v1429_v12 = vsub.s32 %v1426_v8, %v2112_v51 }
 0x2c3   :  { %v1806_v11 = vpop.eup %1805  ;;  %1813 = vrcp.f32 %v1048_v16  ;;  %v1061_v20 = vrot.slane %v1060_v28, 1 }
 0x2c4   :  { %v1080_v9 = vrot.slane %v1079_v14, 2  ;;  %v1070_v21 = vsel %vm947_vm15, %v1806_v11, 0.0  ;;  %v1069_v24 = vadd.f32 %v1068_v37, %v1067_v6 }
 0x2c5   :  { %v1071_v26 = vrot.slane %v1070_v21, 4  ;;  %v1062_v41 = vadd.f32 %v1061_v20, %v1060_v28 }
 0x2c6   :  { %v1081_v15 = vadd.f32 %v1080_v9, %v1079_v14  ;;  %1815 = vrcp.f32 %v1069_v24 }
 0x2c7   :  { %v1072_v48 = vadd.f32 %v1071_v26, %v1070_v21  ;;  %1817 = vrcp.f32 %v1062_v41 }
 0x2c8   :  { %v1808_v49 = vpop.eup %1807  ;;  %v1082_v50 = vrot.slane %v1081_v15, 1 }
 0x2c9   :  { %v1810_v52 = vpop.eup %1809  ;;  %v1073_v53 = vrot.slane %v1072_v48, 2  ;;  %v1093_v54 = vmul.f32 %v1808_v49, %v2316_v17 }
 0x2ca   :  { %v1092_v57 = vmul.f32 %v1810_v52, %v2318_v18  ;;  %v1083_v58 = vadd.f32 %v1082_v50, %v1081_v15 }
 0x2cb   :  { %v1074_v47 = vadd.f32 %v1073_v53, %v1072_v48  ;;  %v1388_v61 = vsel %vm947_vm15, %v1093_v54, 0.0 }
 0x2cc   :  { %v1812_v29 = vpop.eup %1811  ;;  %1389 = vadd.xlane.f32.xlu1 %v1388_v61  ;;  %1708 = vmatprep.mubr.msk.f32.mxu1 %vm947_vm15, %v1092_v57  ;;  %v1385_v62 = vsel %vm947_vm15, %v1092_v57, 0.0  ;;  %1819 = vrcp.f32 %v1083_v58 }
 0x2cd   :  { %v1814_v19 = vpop.eup %1813  ;;  %1386 = vadd.xlane.f32.xlu0 %v1385_v62  ;;  %1709 = vmatmul.mubr.msk.f32.vlgmr.msra.gmra.mrb[16].mxu1 %vm947_vm15, %v1093_v54  ;;  %v1095_v23 = vmul.f32 %v1812_v29, %v2324_v33  ;;  %v1075_v17 = vrot.slane %v1074_v47, 1  ;;  %v1518_v62 = vld [vmem:[%s2441_s14] ss:$0 sm:$0xff] }
 0x2ce   :  { %v1094_v18 = vmul.f32 %v1814_v19, %v2326_v43  ;;  %v358_v19 = vadd.f32 %v1518_v62, %v2233_v35  ;;  %v374_v35 = vadd.f32 %v1518_v62, %v2242_v46 }
 0x2cf   :  { %v1394_v55 = vsel %vm947_vm15, %v1095_v23, 0.0  ;;  %v1076_v63 = vadd.f32 %v1075_v17, %v1074_v47 }
 0x2d0   :  { %v1816_v0 = vpop.eup %1815  ;;  %1711 = vmatprep.mubr.msk.f32.mxu1 %vm947_vm15, %v1094_v18  ;;  %v1391_v33 = vsel %vm947_vm15, %v1094_v18, 0.0 }
 0x2d1   :  { %v1818_v34 = vpop.eup %1817  ;;  %1395 = vadd.xlane.f32.xlu0 %v1394_v55  ;;  %1712 = vmatmul.mubr.msk.f32.gmra.mrb[18].mxu1 %vm947_vm15, %v1095_v23  ;;  %1821 = vrcp.f32 %v1076_v63  ;;  %v1097_v43 = vmul.f32 %v1816_v0, %v2332_v59  ;;  %v1874_v59 = vmov 0.0|0.0   ;;  %v355_v23 = vadd.f32 %v1518_v62, %v2223_v25 }
 0x2d2   :  { %v1096_v30 = vmul.f32 %v1818_v34, %v2334_v32  ;;  %1755 = vmatprep.subr.bf16.mxu1 %v1874_v59  ;;  %v366_v0 = vadd.f32 %v2228_v31, %v1518_v62  ;;  %v363_v34 = vadd.f32 %v2220_v22, %v1518_v62  ;;  %v371_v25 = vadd.f32 %v1518_v62, %v2238_v39 }
 0x2d3   :  { %v1400_v4 = vsel %vm947_vm15, %v1097_v43, 0.0 }
 0x2d4   :  { %1714 = vmatprep.mubr.msk.f32.mxu1 %vm947_vm15, %v1096_v30  ;;  %v1397_v2 = vsel %vm947_vm15, %v1096_v30, 0.0 }
 0x2d5   :  { %1392 = vadd.xlane.f32.xlu0 %v1391_v33  ;;  %1398 = vadd.xlane.f32.xlu1 %v1397_v2 }
 0x2d6   :  { %v1820_v3 = vpop.eup %1819  ;;  %1715 = vmatmul.mubr.msk.f32.gmra.mrb[20].mxu1 %vm947_vm15, %v1097_v43 }
 0x2d7   :  { %v1099_v5 = vmul.f32 %v1820_v3, %v2340_v27  ;;  %v1789_v27 = vld [vmem:[%s2442_s15] sm:$0xff]  }
 0x2d8   :  { %1740 = vmatpush3.bf16.msra.mxu0 %v1789_v27 }
 0x2d9   :  { %1401 = vadd.xlane.f32.xlu0 %v1400_v4  ;;  %v1406_v36 = vsel %vm947_vm15, %v1099_v5, 0.0  ;;  %1741 = vmatprep.subr.bf16.mxu0 %v1871_v1 }
 0x2db   :  { %v1822_v38 = vpop.eup %1821 }
 0x2dc   :  { %v1098_v32 = vmul.f32 %v1822_v38, %v1806_v11  ;;  %1742 = vmatpush3.bf16.msra.mxu0 %v1790_v7 }
 0x2dd   :  { %1407 = vadd.xlane.f32.xlu0 %v1406_v36  ;;  %v382_v36 = vadd.f32 %v2240_v45, %v1518_v62 }
 0x2de   :  { %1717 = vmatprep.mubr.msk.f32.mxu1 %vm947_vm15, %v1098_v32  ;;  %v1403_v40 = vsel %vm947_vm15, %v1098_v32, 0.0 }
 0x2df   :  { %1404 = vadd.xlane.f32.xlu1 %v1403_v40  ;;  %1718 = vmatmul.mubr.msk.f32.gmra.mrb[22].mxu1 %vm947_vm15, %v1099_v5  ;;  %vm1461_vm15 = vcmask 1042434   ;;  %v379_v40 = vadd.f32 %v2236_v42, %v1518_v62 }
 0x2e0   :  { %1736 = vmatprep.mubr.msk.f32.mxu1 %vm1872_vm0, %v1871_v1  ;;  %vm1459_vm0 = vcmask 1041409  }
 0x359   :  { %v1390_v10 = vpop.xlane.xlu1 %1389 }
 0x35a   :  { %v1387_v56 = vpop.xlane.xlu0 %1386  ;;  %v1410_v6 = vmul.f32 0.25, %v1390_v10 }
 0x35b   :  { %v1409_v60 = vmul.f32 0.25, %v1387_v56  ;;  %v1234_v56 = vld [vmem:[%s2435_s8] sm:$0xff] }
 0x35c   :  { %v1434_v28 = vrot.slane %v1410_v6, %v1429_v12 }
 0x35d   :  { %v1430_v16 = vrot.slane %v1409_v60, %v1429_v12 }
 0x35e   :  { %v1396_v13 = vpop.xlane.xlu0 %1395 }
 0x35f   :  { %v1412_v14 = vmul.f32 0.25, %v1396_v13  ;;  %v1460_v21 = vsel %vm1459_vm0, %v1434_v28, %v1430_v16 }
 0x361   :  { %v1442_v44 = vrot.slane %v1412_v14, %v1429_v12 }
 0x362   :  { %v1393_v37 = vpop.xlane.xlu0 %1392  ;;  %v1399_v11 = vpop.xlane.xlu1 %1398 }
 0x363   :  { %v1411_v20 = vmul.f32 0.25, %v1393_v37  ;;  %v1413_v1 = vmul.f32 0.25, %v1399_v11 }
 0x365   :  { %v1438_v9 = vrot.slane %v1411_v20, %v1429_v12  ;;  %v1446_v15 = vrot.slane %v1413_v1, %v1429_v12 }
 0x366   :  { %v1402_v24 = vpop.xlane.xlu0 %1401 }
 0x367   :  { %v1462_v26 = vsel %vm1461_vm15, %v1438_v9, %v1460_v21  ;;  %v1414_v41 = vmul.f32 0.25, %v1402_v24 }
 0x368   :  { %v1464_v51 = vsel %vm1463_vm4, %v1442_v44, %v1462_v26 }
 0x369   :  { %v1450_v48 = vrot.slane %v1414_v41, %v1429_v12  ;;  %v1466_v50 = vsel %vm1465_vm6, %v1446_v15, %v1464_v51 }
 0x36a   :  { %v1408_v49 = vpop.xlane.xlu0 %1407 }
 0x36b   :  { %v1416_v52 = vmul.f32 0.25, %v1408_v49  ;;  %v1468_v57 = vsel %vm1467_vm7, %v1450_v48, %v1466_v50 }
 0x36c   :  { %v1405_v53 = vpop.xlane.xlu1 %1404 }
 0x36d   :  { %v1415_v54 = vmul.f32 0.25, %v1405_v53  ;;  %v1458_v58 = vrot.slane %v1416_v52, %v1429_v12 }
 0x36f   :  { %v1454_v47 = vrot.slane %v1415_v54, %v1429_v12 }
 0x371   :  { %v1470_v61 = vsel %vm1469_vm8, %v1454_v47, %v1468_v57 }
 0x372   :  { %v1472_v29 = vsel %vm1471_vm9, %v1458_v58, %v1470_v61 }
 0x373   :  { %1474 = vst.msk [vmem:[#allocation4] sm:$0xff] %vm393_vm2, %v1472_v29  ;;  %vm1243_vm2 = vcmask 523264  }
 0x3a0   :  { %v1710_v17 = vpop.f32.mrb[16].mxu1 }
 0x3a1   :  { %v1236_v18 = vmul.f32 %v1710_v17, %v358_v19  ;;  %v1195_v55 = vpop.f32.mrb[17].mxu1 }
 0x3a2   :  { %v1235_v63 = vmul.f32 %v1195_v55, %v355_v23 }
 0x3a4   :  { %v1756_v30 = vpack.c.bf16 %v1236_v18, %v1235_v63  ;;  %v1713_v33 = vpop.f32.mrb[18].mxu1 }
 0x3a5   :  { %v1238_v2 = vmul.f32 %v1713_v33, %v366_v0  ;;  %v1205_v43 = vpop.f32.mrb[19].mxu1 }
 0x3a6   :  { %v1237_v3 = vmul.f32 %v1205_v43, %v363_v34  ;;  %1757 = vmatpush3.bf16.msra.mxu1 %v1756_v30 }
 0x3a7   :  { %1758 = vmatprep.subr.bf16.mxu1 %v1874_v59 }
 0x3a8   :  { %v1759_v4 = vpack.c.bf16 %v1238_v2, %v1237_v3 }
 0x3a9   :  { %v1716_v5 = vpop.f32.mrb[20].mxu1 }
 0x3aa   :  { %v1240_v38 = vmul.f32 %v1716_v5, %v374_v35  ;;  %v1215_v32 = vpop.f32.mrb[21].mxu1  ;;  %1760 = vmatpush3.bf16.msra.mxu1 %v1759_v4 }
 0x3ab   :  { %v1239_v31 = vmul.f32 %v1215_v32, %v371_v25  ;;  %1761 = vmatprep.subr.bf16.mxu1 %v1874_v59 }
 0x3ad   :  { %v1762_v22 = vpack.c.bf16 %v1240_v38, %v1239_v31 }
 0x3af   :  { %1763 = vmatpush3.bf16.msra.mxu1 %v1762_v22 }
 0x3b0   :  { %1764 = vmatprep.subr.bf16.mxu1 %v1874_v59 }
 0x3b2   :  { %v1719_v27 = vpop.f32.mrb[22].mxu1 }
 0x3b3   :  { %v1242_v46 = vmul.f32 %v1719_v27, %v382_v36  ;;  %v1225_v7 = vpop.f32.mrb[23].mxu1 }
 0x3b4   :  { %v1241_v8 = vmul.f32 %v1225_v7, %v379_v40 }
 0x3b6   :  { %v1765_v39 = vpack.c.bf16 %v1242_v46, %v1241_v8 }
 0x3b8   :  { %1766 = vmatpush3.bf16.msra.mxu1 %v1765_v39 }
 0x3bb   :  { %1737 = vmatmul.mubr.msk.f32.vlgmr.msra.gmra.mrb[24].mxu1 %vm1243_vm2, %v1234_v56 }
 0x48e   :  { %v1313_v10 = vpop.f32.mrb[24].mxu1 }
 0x48f   :  { %v1317_v12 = vpack.c.bf16 %v1313_v10, %v1313_v10  ;;  %v1738_v6 = vpop.f32.mrb[25].mxu1 }
 0x491   :  { %1744 = vmatmul.mubr.msk.bf16.vlgmr.msra.gmra.mrb[20].mxu0 %vm85_vm1, %v1317_v12 }
 0x492   :  { %1834 = shalt.err (!%p1831_p4)
}
 0x493   :  { %s1835_s8 = scalar_lea.hbm %s2445_s18, 128 }
 0x494   :  { %p1836_p5 = scmp.ne.s32.totalorder %s2445_s18, %s1835_s8  ;;  %p1839_p6 = scmp.lt.u32.totalorder %s1835_s8, %s2445_s18 }
 0x496   :  { %p1841_p7 = pnand %p1839_p6, %p1836_p5 }
 0x498   :  { %1844 = shalt.err (!%p1841_p7)
}
 0x499   :  { %1494 = dma.vmem_to_hbm [thread:$0]  %s1492_s25, 128, %s2445_s18, [#allocation5]   ;;  %v1579_v42 = vld [vmem:[%s2443_s16] ss:$0 sm:$0xff] }
 0x49a   :  { %s1876_s20 = smov [#allocation2]  }
 0x49b   :  { %s1481_s21 = sshll.u32 %s1876_s20, 4  ;;  %s1482_s21 = int_to_ptr.vmem [resolvable:$true] %s1481_s21 }
 0x49c   :  { %s1845_s28 = scalar_lea.vmem %s1482_s21, 128  ;;  %p1850_p9 = scmp.lt.s32.totalorder %s1482_s21, %s1482_s21 }
 0x49d   :  { %p1846_p8 = scmp.ne.s32.totalorder %s1482_s21, %s1845_s28  ;;  %p1851_p10 = scmp.lt.s32.totalorder %s1845_s28, %s1845_s28 }
 0x49f   :  { %p1852_p11 = por %p1851_p10, %p1850_p9 }
 0x4a1   :  { %p1853_p12 = pnand %p1852_p11, %p1846_p8 }
 0x564   :  { %v1378_v45 = vpop.f32.mrb[20].mxu0 }
 0x565   :  { %v1379_v59 = vadd.f32 %v1579_v42, %v1378_v45  ;;  %v1745_v60 = vpop.f32.mrb[21].mxu0 }
 0x566   :  { %v1381_v13 = vpop.f32.mrb[22].mxu0 }
 0x567   :  { %1384 = vst.msk [vmem:[#allocation2] sm:$0xff] %vm85_vm1, %v1379_v59  ;;  %v1746_v28 = vpop.f32.mrb[23].mxu0 }
 0x568   :  { %1856 = shalt.err (!%p1853_p12)
}
 0x569   :  { %s1857_s16 = scalar_lea.hbm %s2444_s17, 128 }
 0x56a   :  { %p1858_p13 = scmp.ne.s32.totalorder %s2444_s17, %s1857_s16  ;;  %p1861_p0 = scmp.lt.u32.totalorder %s1857_s16, %s2444_s17 }
 0x56c   :  { %p1863_p1 = pnand %p1861_p0, %p1858_p13 }
 0x56e   :  { %1866 = shalt.err (!%p1863_p1)
}
 0x56f   :  { %1484 = dma.vmem_to_hbm [thread:$0]  %s1482_s21, 128, %s2444_s17, [#allocation3]  }
 0x570   :  { %1867 = dma.done.wait [#allocation3], 128  }
 0x571   :  { %1868 = vsyncadd [#allocation3], 4294967168 }
 0x572   :  { %1869 = dma.done.wait [#allocation5], 128  }
 0x573   :  { %1870 = vsyncadd [#allocation5], 4294967168 }
 0x574   :  { %1501 = vsyncpa [#allocation3], 1 }
 0x575   :  { %1502 = vsyncpa [#allocation5], 1 }

</bundles_post_ra>
